<compile_context>
chip_gen: v6e
topology: v6e:2x2x1
jax: 0.10.0
libtpu: 0.0.40
codegen_flags: <defaults>
</compile_context>

<pallas_src>
import jax
import jax.numpy as jnp
from jax import lax
from jax.experimental import pallas as pl
from jax.experimental.pallas import tpu as pltpu

IN_FEATURES = 24
OUT_FEATURES = 2
OUT_PAD = 8       # pad the 2 output features to one sublane group
LANE = 128        # batch tile granularity so output stores are lane-dense


def _round_up(x, m):
    return (x + m - 1) // m * m


def _cdiv(a, b):
    return (a + b - 1) // b


def linear_kernel(x_ref, w_ref, b_ref, o_ref):
    # x: (tb, 24), w: (8, 24) (rows >= 2 are zero), b: (8, 1), o: (8, tb)
    # Contract the feature axis of both operands -> (8, tb): batch on lanes,
    # padded output features on sublanes.  The implicit RHS transpose rides the
    # XLU slot, which has full slack in this DMA-bound kernel.
    acc = lax.dot_general(
        w_ref[...], x_ref[...],
        dimension_numbers=(((1,), (1,)), ((), ())),
        preferred_element_type=jnp.float32,
    )
    o_ref[...] = (acc + b_ref[...]).astype(o_ref.dtype)


def prepare_params(weight, bias, dtype=jnp.float32):
    """Pad nn.Linear params once per weight update (hoisted out of forward).

    weight: (2, 24) in PyTorch (out, in) layout; bias: (2,).
    Returns w_pad (8, 24) and b_pad (8, 1) with zero rows beyond the 2 real outputs.
    """
    out_f, in_f = weight.shape
    w_pad = jnp.zeros((OUT_PAD, in_f), dtype).at[:out_f, :].set(weight.astype(dtype))
    b_pad = jnp.zeros((OUT_PAD, 1), dtype).at[:out_f, 0].set(bias.astype(dtype))
    return w_pad, b_pad


def logistic_model_forward(x, w_pad, b_pad, *, block_b=8192, single_shot_max=1024):
    """x: (B, 24) f32; w_pad/b_pad from prepare_params.  Returns (B, 2)."""
    B, in_f = x.shape

    if B <= single_shot_max:
        # Single-shot: no grid, no pipeline bookkeeping; everything in VMEM.
        out = pl.pallas_call(
            linear_kernel,
            out_shape=jax.ShapeDtypeStruct((OUT_PAD, B), x.dtype),
            in_specs=[
                pl.BlockSpec(memory_space=pltpu.MemorySpace.VMEM),
                pl.BlockSpec(memory_space=pltpu.MemorySpace.VMEM),
                pl.BlockSpec(memory_space=pltpu.MemorySpace.VMEM),
            ],
            out_specs=pl.BlockSpec(memory_space=pltpu.MemorySpace.VMEM),
        )(x, w_pad, b_pad)
        return out[:OUT_FEATURES, :].T

    # --- Grid path: stream the batch through VMEM, weights/bias resident. ---
    # Pick a lane-aligned batch tile; force an even block count (>= 2) so both
    # v7x TensorCores get balanced work under dimension_semantics="parallel".
    tb_pref = max(LANE, _round_up(min(block_b, B), LANE))
    n_blocks = _cdiv(B, tb_pref)
    n_blocks = max(2, _round_up(n_blocks, 2))
    tb = _round_up(_cdiv(B, n_blocks), LANE)
    b_rows = n_blocks * tb
    if b_rows != B:
        x = jnp.pad(x, ((0, b_rows - B), (0, 0)))

    out = pl.pallas_call(
        linear_kernel,
        out_shape=jax.ShapeDtypeStruct((OUT_PAD, b_rows), x.dtype),
        grid_spec=pl.GridSpec(
            grid=(n_blocks,),
            in_specs=[
                pl.BlockSpec((tb, in_f), lambda i: (i, 0)),       # x tile
                pl.BlockSpec((OUT_PAD, in_f), lambda i: (0, 0)),  # weights (resident)
                pl.BlockSpec((OUT_PAD, 1), lambda i: (0, 0)),     # bias (resident)
            ],
            out_specs=pl.BlockSpec((OUT_PAD, tb), lambda i: (0, i)),
        ),
        compiler_params=pltpu.CompilerParams(
            dimension_semantics=("parallel",)),
    )(x, w_pad, b_pad)

    # Only the 2 real rows are read back (lane-contiguous), then a tiny (2, B)
    # transpose to match the nn.Linear (B, 2) output layout.
    return out[:OUT_FEATURES, :B].T


if __name__ == "__main__":
    key = jax.random.PRNGKey(0)
    kx, kw, kb, kx2 = jax.random.split(key, 4)

    B = 8
    x = jax.random.normal(kx, (B, IN_FEATURES), dtype=jnp.float32)
    # Deterministic "init" mimicking nn.Linear's uniform(-1/sqrt(24), 1/sqrt(24))
    bound = 1.0 / jnp.sqrt(jnp.float32(IN_FEATURES))
    weight = jax.random.uniform(kw, (OUT_FEATURES, IN_FEATURES), jnp.float32, -bound, bound)
    bias = jax.random.uniform(kb, (OUT_FEATURES,), jnp.float32, -bound, bound)

    # Padded params built once (hoisted out of the per-call forward path).
    w_pad, b_pad = prepare_params(weight, bias)

    # Small batch: exercises the no-grid single-shot path.
    out = logistic_model_forward(x, w_pad, b_pad)
    jax.block_until_ready(out)
    ref = x @ weight.T + bias
    assert out.shape == (B, OUT_FEATURES)
    assert jnp.allclose(out, ref, atol=1e-5, rtol=1e-5)

    # Larger / unaligned batch: exercises the tiled grid path (even block count,
    # lane-dense transposed output, batch padding).
    B2 = 1030
    x2 = jax.random.normal(kx2, (B2, IN_FEATURES), dtype=jnp.float32)
    out2 = logistic_model_forward(x2, w_pad, b_pad)
    jax.block_until_ready(out2)
    ref2 = x2 @ weight.T + bias
    assert out2.shape == (B2, OUT_FEATURES)
    assert jnp.allclose(out2, ref2, atol=1e-5, rtol=1e-5)

    print("KERNEL_OK")
</pallas_src>

<mosaic_0001>
module attributes {stable_mosaic.version = 11 : i64} {
  func.func @linear_kernel(%arg0: memref<8x24xf32, #tpu.memory_space<vmem>>, %arg1: memref<8x24xf32, #tpu.memory_space<vmem>>, %arg2: memref<8x1xf32, #tpu.memory_space<vmem>>, %arg3: memref<8x8xf32, #tpu.memory_space<vmem>>) attributes {dimension_semantics = [], scalar_prefetch = 0 : i64, scratch_operands = 0 : i64, tpu.core_type = #tpu.core_type<tc>} {
    %c0 = arith.constant 0 : index
    %c0_0 = arith.constant 0 : index
    %0 = vector.load %arg1[%c0, %c0_0] : memref<8x24xf32, #tpu.memory_space<vmem>>, vector<8x24xf32>
    %c0_1 = arith.constant 0 : index
    %c0_2 = arith.constant 0 : index
    %1 = vector.load %arg0[%c0_1, %c0_2] : memref<8x24xf32, #tpu.memory_space<vmem>>, vector<8x24xf32>
    %cst = arith.constant dense<0.000000e+00> : vector<8x8xf32>
    %2 = tpu.matmul %0, %1, %cst {dimension_numbers = #tpu.dot_dimension_numbers<[1], [1], [0], [0], [0, 0, 1, 0], [], []>} : vector<8x24xf32>, vector<8x24xf32>, vector<8x8xf32> -> vector<8x8xf32>
    %c0_3 = arith.constant 0 : index
    %c0_4 = arith.constant 0 : index
    %3 = vector.load %arg2[%c0_3, %c0_4] : memref<8x1xf32, #tpu.memory_space<vmem>>, vector<8x1xf32>
    %4 = vector.broadcast %3 : vector<8x1xf32> to vector<8x8xf32>
    %5 = arith.addf %2, %4 : vector<8x8xf32>
    %c0_5 = arith.constant 0 : index
    %c0_6 = arith.constant 0 : index
    %6 = vector.load %arg3[%c0_5, %c0_6] : memref<8x8xf32, #tpu.memory_space<vmem>>, vector<8x8xf32>
    tpu.vector_store %arg3[%c0_5, %c0_6], %5 {strides = array<i32>} : memref<8x8xf32, #tpu.memory_space<vmem>>, vector<8x8xf32>,
    return
  }
}

</mosaic_0001>

<bundles_post_ra>
// kernel: tpu_custom_call.1
= control target key start
LH: loop header
LB: loop body
LE: loop exit
PB: predicated region body
PF: predicated region fallthrough
CT: control target
= control target key end

     0   :  { %8 = vsyncpa [#allocation3], 0  ;;  %s225_s0 = inlined_call_operand.vmem [shape: f32[8,24], index: 0, kind: input, shape index: {}]   ;;  %s226_s1 = inlined_call_operand.hbm [shape: f32[8,24], index: 1, kind: input, shape index: {}]   ;;  %s227_s2 = inlined_call_operand.vmem [shape: f32[8,1], index: 2, kind: input, shape index: {}]   ;;  %s228_s3 = inlined_call_operand.hbm [shape: f32[8,8], index: 3, kind: output, shape index: {}]  }
   0x1   :  { %9 = vsyncpa [#allocation4], 0  ;;  %s188_s12 = smov [#allocation2]  }
   0x2   :  { %s18_s13 = sshll.u32 %s188_s12, 4  ;;  %s19_s13 = int_to_ptr.vmem [resolvable:$true] %s18_s13 }
   0x3   :  { %s152_s14 = scalar_lea.vmem %s19_s13, 128  ;;  %p157_p1 = scmp.lt.s32.totalorder %s19_s13, %s19_s13 }
   0x4   :  { %p153_p0 = scmp.ne.s32.totalorder %s19_s13, %s152_s14  ;;  %p158_p2 = scmp.lt.s32.totalorder %s152_s14, %s152_s14 }
   0x6   :  { %p159_p3 = por %p158_p2, %p157_p1 }
   0x8   :  { %p160_p4 = pnand %p159_p3, %p153_p0 }
   0xa   :  { %163 = shalt.err (!%p160_p4)
}
   0xb   :  { %21 = dma.hbm_to_vmem [thread:$0]  %s226_s1, 128, %s19_s13, [#allocation3]  }
   0xc   :  { %184 = dma.done.wait [#allocation3], 128  }
   0xd   :  { %185 = vsyncadd [#allocation3], 4294967168  ;;  %v189_v0 = vmov 0.0   ;;  %vm190_vm0 = vmmov 0   ;;  %v191_v1 = vmov 0   ;;  %vm35_vm1 = vcmask 195584  }
   0xe   :  { %133 = vmatprep.subr.mxu0 %v189_v0  ;;  %135 = vmatprep.mubr.msk.f32.mxu0 %vm190_vm0, %v189_v0  ;;  %v28_v2 = vld [vmem:[%s225_s0] sm:$0xff]  ;;  %s192_s1 = smov [#allocation5]   ;;  %vm112_vm2 = vcmask 64512  }
   0xf   :  { %143 = vset.pattern.permute.xlu0 %v191_v1  ;;  %v29_v3 = vld [vmem:[%s227_s2] sm:$0xff]  ;;  %134 = vmatpush3.xpose.msk.msra.mxu0 %vm35_vm1, %v28_v2  ;;  %s120_s21 = sshll.u32 %s192_s1, 4  ;;  %s121_s21 = int_to_ptr.vmem [resolvable:$true] %s120_s21 }
  0x10   :  { %v27_v4 = vld [vmem:[#allocation2] sm:$0xff]  ;;  %32 = vperm.xlu0 %143, %v29_v3   ;;  %s164_s22 = scalar_lea.vmem %s121_s21, 128  ;;  %p169_p6 = scmp.lt.s32.totalorder %s121_s21, %s121_s21 }
  0x11   :  { %p165_p5 = scmp.ne.s32.totalorder %s121_s21, %s164_s22  ;;  %p170_p7 = scmp.lt.s32.totalorder %s164_s22, %s164_s22 }
  0x12   :  { %136 = vmatmul.mubr.msk.f32.vlgmr.msra.gmra.mxu0 %vm35_vm1, %v27_v4 }
  0x13   :  { %p171_p8 = por %p170_p7, %p169_p6 }
  0x15   :  { %p172_p9 = pnand %p171_p8, %p165_p5 }
  0x8b   :  { %v33_v5 = vpop.permute.xlu0 %32 }
  0xd2   :  { %v108_v6 = vpop.f32.mrf.mxu0 }
  0xd3   :  { %v109_v7 = vadd.f32 %v108_v6, %v33_v5 }
  0xd4   :  { %v137_v8 = vpop.f32.mrf.mxu0 }
  0xd5   :  { %113 = vst.msk [vmem:[#allocation5] sm:$0xff] %vm112_vm2, %v109_v7 }
  0xd6   :  { %175 = shalt.err (!%p172_p9)
}
  0xd7   :  { %123 = dma.vmem_to_hbm [thread:$0]  %s121_s21, 128, %s228_s3, [#allocation4]  }
  0xd8   :  { %186 = dma.done.wait [#allocation4], 128  }
  0xd9   :  { %187 = vsyncadd [#allocation4], 4294967168 }
  0xda   :  { %127 = vsyncpa [#allocation3], 1 }
  0xdb   :  { %128 = vsyncpa [#allocation4], 1 }

</bundles_post_ra>
